<compile_context>
chip_gen: v5e
topology: v5e:2x2
jax: 0.10.0
libtpu: 0.0.40
codegen_flags: <defaults>
</compile_context>

<pallas_src>
import jax
import jax.numpy as jnp
from jax.experimental import pallas as pl
from jax.experimental.pallas import tpu as pltpu

POOL_W = 20   # AdaptiveMaxPool2d((1, 20))
BN_EPS = 1e-5


def local_kernel(x_ref, w1_ref, b1_ref, w2_ref, b2_ref, o_ref):
    # x_ref : (TB, C1, H, W)  VMEM block, natural NCHW layout
    # w1_ref: (C1*C1*3,) SMEM -- cnn1 weights with BN1 scale folded in
    # b1_ref: (C1,)      SMEM -- folded BN1 bias
    # w2_ref: (C2*C1,)   SMEM -- cnn2 (1x1) weights with BN2 scale folded in
    # b2_ref: (C2,)      SMEM -- folded BN2 bias
    # o_ref : (1, TB, C2*W)   -- column j*r of channel-c slab holds bin j
    TB, C1, H, W = x_ref.shape
    C2 = b2_ref.shape[0]
    r = W // POOL_W

    zpad = jnp.zeros((TB, r), jnp.float32)

    # ---- AdaptiveMaxPool2d((1, 20)) at W resolution -------------------------
    # pooled[ci][:, j*r] == max over (h, t<r) of x[:, ci, h, j*r + t]
    pooled = []
    for ci in range(C1):
        hg = 8 if H % 8 == 0 else H          # reduce in sublane-sized groups
        acc = None
        for h0 in range(0, H, hg):
            blk = x_ref[:, ci, h0:h0 + hg, :].astype(jnp.float32)   # (TB, hg, W)
            acc = blk if acc is None else jnp.maximum(acc, blk)
        xw = jnp.max(acc, axis=1)                                   # (TB, W)
        m = xw
        for t in range(1, r):                # bin-max via lane shifts (no strided ops)
            sh = jnp.concatenate(
                [xw[:, t:], jnp.zeros((TB, t), jnp.float32)], axis=1)
            m = jnp.maximum(m, sh)           # pad columns never feed bin columns
        pooled.append(m)                                            # (TB, W)

    # ---- cnn1: Conv2d(C1->C1, kernel (1,3), pad (0,1)) + folded BN1 + ReLU ---
    # In bin space the +/-1 taps are +/- r columns at W resolution.
    shifted = []
    for ci in range(C1):
        m = pooled[ci]
        left = jnp.concatenate([zpad, m[:, :W - r]], axis=1)   # bin j-1 (0 at j=0)
        right = jnp.concatenate([m[:, r:], zpad], axis=1)      # bin j+1 (0 at j=19)
        shifted.append((left, m, right))

    ys = []
    for co in range(C1):
        acc = jnp.zeros((TB, W), jnp.float32) + b1_ref[co]
        for ci in range(C1):
            for k in range(3):
                acc = acc + w1_ref[(co * C1 + ci) * 3 + k] * shifted[ci][k]
        ys.append(jnp.maximum(acc, 0.0))

    # Dropout2d(0.2): identity in eval/inference mode.
    # TODO(synk): training-mode channel dropout / BatchNorm batch stats not reproduced.

    # ---- cnn2: Conv2d(C1->C2, kernel 1) + folded BN2 + ReLU ------------------
    zs = []
    for co in range(C2):
        acc = jnp.zeros((TB, W), jnp.float32) + b2_ref[co]
        for ci in range(C1):
            acc = acc + w2_ref[co * C1 + ci] * ys[ci]
        zs.append(jnp.maximum(acc, 0.0))

    # Lane-dense store; the wrapper extracts every r-th column afterwards.
    o_ref[...] = jnp.concatenate(zs, axis=1)[None].astype(o_ref.dtype)


def _fold_bn(w, bn):
    """Fold inference BatchNorm into conv weights: returns (scaled_w, bias)."""
    g, b, m, v = (jnp.asarray(t, jnp.float32) for t in bn)
    s = g * jax.lax.rsqrt(v + BN_EPS)
    w_f = jnp.asarray(w, jnp.float32) * s[:, None, None, None]
    b_f = b - m * s
    return w_f, b_f


def _pick_batch_tile(B, bytes_per_batch, target_bytes):
    cap = max(1, int(target_bytes // max(1, bytes_per_batch)))
    if B > 1:
        cap = min(cap, max(1, B // 2))   # keep >= 2 grid steps (megacore-friendly)
    for t in range(min(cap, B), 0, -1):
        if B % t == 0:
            return t
    return 1


def local_forward(x, w1, w2, bn1, bn2, *, target_block_bytes=4 << 20):
    """x: (B, C1, H, W) NCHW, W % 20 == 0.  Returns (B, C2, 1, 20) float32."""
    B, C1, H, W = x.shape
    assert W % POOL_W == 0, "kernel assumes W is a multiple of 20"
    # TODO(synk): PyTorch adaptive pooling with uneven bins (W % 20 != 0) not supported.
    C2 = w2.shape[0]
    r = W // POOL_W

    w1f, b1f = _fold_bn(w1, bn1)              # (C1, C1, 1, 3), (C1,)
    w2f, b2f = _fold_bn(w2, bn2)              # (C2, C1, 1, 1), (C2,)
    w1f = w1f.reshape(-1)                     # (C1*C1*3,)
    w2f = w2f.reshape(-1)                     # (C2*C1,)

    itemsize = jnp.dtype(x.dtype).itemsize
    TB = _pick_batch_tile(B, C1 * H * W * itemsize, target_block_bytes)
    G = B // TB

    out = pl.pallas_call(
        local_kernel,
        out_shape=jax.ShapeDtypeStruct((G, TB, C2 * W), jnp.float32),
        grid=(G,),
        in_specs=[
            pl.BlockSpec((TB, C1, H, W), lambda b: (b, 0, 0, 0)),
            pl.BlockSpec(memory_space=pltpu.MemorySpace.SMEM),
            pl.BlockSpec(memory_space=pltpu.MemorySpace.SMEM),
            pl.BlockSpec(memory_space=pltpu.MemorySpace.SMEM),
            pl.BlockSpec(memory_space=pltpu.MemorySpace.SMEM),
        ],
        out_specs=pl.BlockSpec((1, TB, C2 * W), lambda b: (b, 0, 0)),
        compiler_params=pltpu.CompilerParams(
            dimension_semantics=("parallel",)),
    )(x, w1f, b1f, w2f, b2f)

    # Tiny post-processing: keep every r-th column (the bin columns).
    out = out.reshape(B, C2, W)[:, :, ::r]            # (B, C2, 20)
    return out.reshape(B, C2, 1, POOL_W)


def local_reference(x, w1, w2, bn1, bn2):
    """Pure-JAX reference mirroring the PyTorch forward (eval mode)."""
    B, C, H, W = x.shape
    r = W // POOL_W
    p = x.reshape(B, C, H, POOL_W, r).max(axis=(2, 4)).reshape(B, C, 1, POOL_W)

    def conv(inp, w, pad):
        return jax.lax.conv_general_dilated(
            inp, w, (1, 1), ((0, 0), pad),
            dimension_numbers=("NCHW", "OIHW", "NCHW"))

    def bn(inp, params):
        g, b, m, v = params
        s = g * jax.lax.rsqrt(v + BN_EPS)
        return (inp - m[None, :, None, None]) * s[None, :, None, None] + b[None, :, None, None]

    y = jnp.maximum(bn(conv(p, w1, (1, 1)), bn1), 0.0)
    z = jnp.maximum(bn(conv(y, w2, (0, 0)), bn2), 0.0)
    return z


if __name__ == "__main__":
    key = jax.random.PRNGKey(0)
    ks = jax.random.split(key, 12)

    B, C1, C2, H, W = 2, 3, 3, 16, 40   # dim1 = dim2 = 3 (module defaults)

    x = jax.random.normal(ks[0], (B, C1, H, W), jnp.float32)

    # Deterministic synthetic parameters (not a checkpoint).
    w1 = 0.5 * jax.random.normal(ks[1], (C1, C1, 1, 3), jnp.float32)   # cnn1 weight
    w2 = 0.5 * jax.random.normal(ks[2], (C2, C1, 1, 1), jnp.float32)   # cnn2 weight

    bn1 = (1.0 + 0.1 * jax.random.normal(ks[3], (C1,), jnp.float32),    # gamma
           0.1 * jax.random.normal(ks[4], (C1,), jnp.float32),           # beta
           0.1 * jax.random.normal(ks[5], (C1,), jnp.float32),           # running_mean
           0.5 + jnp.abs(jax.random.normal(ks[6], (C1,), jnp.float32)))  # running_var
    bn2 = (1.0 + 0.1 * jax.random.normal(ks[7], (C2,), jnp.float32),
           0.1 * jax.random.normal(ks[8], (C2,), jnp.float32),
           0.1 * jax.random.normal(ks[9], (C2,), jnp.float32),
           0.5 + jnp.abs(jax.random.normal(ks[10], (C2,), jnp.float32)))

    out = local_forward(x, w1, w2, bn1, bn2)
    out = jax.block_until_ready(out)

    ref = local_reference(x, w1, w2, bn1, bn2)
    assert out.shape == (B, C2, 1, POOL_W), out.shape
    assert jnp.allclose(out, ref, atol=2e-4, rtol=2e-4), float(jnp.max(jnp.abs(out - ref)))

    print("KERNEL_OK")
</pallas_src>

<mosaic_0001>
module attributes {stable_mosaic.version = 11 : i64} {
  func.func @local_kernel(%arg0: i32, %arg1: memref<1x3x16x40xf32, #tpu.memory_space<vmem>>, %arg2: memref<27xf32, #tpu.memory_space<smem>>, %arg3: memref<3xf32, #tpu.memory_space<smem>>, %arg4: memref<9xf32, #tpu.memory_space<smem>>, %arg5: memref<3xf32, #tpu.memory_space<smem>>, %arg6: memref<1x1x120xf32, #tpu.memory_space<vmem>>) attributes {dimension_semantics = [#tpu.dimension_semantics<parallel>], iteration_bounds = array<i64: 2>, scalar_prefetch = 0 : i64, scratch_operands = 0 : i64, tpu.core_type = #tpu.core_type<tc>, window_params = [{transform_indices = @transform_0, window_bounds = array<i64: 1, 3, 16, 40>}, {transform_indices = @transform_1, window_bounds = array<i64: 27>}, {transform_indices = @transform_2, window_bounds = array<i64: 3>}, {transform_indices = @transform_3, window_bounds = array<i64: 9>}, {transform_indices = @transform_4, window_bounds = array<i64: 3>}, {transform_indices = @transform_5, window_bounds = array<i64: 1, 1, 120>}]} {
    %cst = arith.constant 0.000000e+00 : f32
    %0 = vector.broadcast %cst : f32 to vector<1x2xf32>
    %c0 = arith.constant 0 : index
    %c0_0 = arith.constant 0 : index
    %c0_1 = arith.constant 0 : index
    %c0_2 = arith.constant 0 : index
    %1 = vector.load %arg1[%c0, %c0_0, %c0_1, %c0_2] : memref<1x3x16x40xf32, #tpu.memory_space<vmem>>, vector<1x1x8x40xf32>
    %2 = vector.shape_cast %1 : vector<1x1x8x40xf32> to vector<1x8x40xf32>
    %c0_3 = arith.constant 0 : index
    %c0_4 = arith.constant 0 : index
    %c8 = arith.constant 8 : index
    %c0_5 = arith.constant 0 : index
    %3 = vector.load %arg1[%c0_3, %c0_4, %c8, %c0_5] : memref<1x3x16x40xf32, #tpu.memory_space<vmem>>, vector<1x1x8x40xf32>
    %4 = vector.shape_cast %3 : vector<1x1x8x40xf32> to vector<1x8x40xf32>
    %5 = arith.maximumf %2, %4 : vector<1x8x40xf32>
    %cst_6 = arith.constant dense<0xFF800000> : vector<1x40xf32>
    %6 = vector.multi_reduction <maximumf>, %5, %cst_6 [1] : vector<1x8x40xf32> to vector<1x40xf32>
    %7 = vector.extract_strided_slice %6 {offsets = [0, 1], sizes = [1, 39], strides = [1, 1]} : vector<1x40xf32> to vector<1x39xf32>
    %cst_7 = arith.constant 0.000000e+00 : f32
    %8 = vector.broadcast %cst_7 : f32 to vector<1x1xf32>
    %9 = tpu.concatenate %7, %8 in 1 : vector<1x39xf32>, vector<1x1xf32> -> vector<1x40xf32>
    %10 = arith.maximumf %6, %9 : vector<1x40xf32>
    %c0_8 = arith.constant 0 : index
    %c1 = arith.constant 1 : index
    %c0_9 = arith.constant 0 : index
    %c0_10 = arith.constant 0 : index
    %11 = vector.load %arg1[%c0_8, %c1, %c0_9, %c0_10] : memref<1x3x16x40xf32, #tpu.memory_space<vmem>>, vector<1x1x8x40xf32>
    %12 = vector.shape_cast %11 : vector<1x1x8x40xf32> to vector<1x8x40xf32>
    %c0_11 = arith.constant 0 : index
    %c1_12 = arith.constant 1 : index
    %c8_13 = arith.constant 8 : index
    %c0_14 = arith.constant 0 : index
    %13 = vector.load %arg1[%c0_11, %c1_12, %c8_13, %c0_14] : memref<1x3x16x40xf32, #tpu.memory_space<vmem>>, vector<1x1x8x40xf32>
    %14 = vector.shape_cast %13 : vector<1x1x8x40xf32> to vector<1x8x40xf32>
    %15 = arith.maximumf %12, %14 : vector<1x8x40xf32>
    %cst_15 = arith.constant dense<0xFF800000> : vector<1x40xf32>
    %16 = vector.multi_reduction <maximumf>, %15, %cst_15 [1] : vector<1x8x40xf32> to vector<1x40xf32>
    %17 = vector.extract_strided_slice %16 {offsets = [0, 1], sizes = [1, 39], strides = [1, 1]} : vector<1x40xf32> to vector<1x39xf32>
    %cst_16 = arith.constant 0.000000e+00 : f32
    %18 = vector.broadcast %cst_16 : f32 to vector<1x1xf32>
    %19 = tpu.concatenate %17, %18 in 1 : vector<1x39xf32>, vector<1x1xf32> -> vector<1x40xf32>
    %20 = arith.maximumf %16, %19 : vector<1x40xf32>
    %c0_17 = arith.constant 0 : index
    %c2 = arith.constant 2 : index
    %c0_18 = arith.constant 0 : index
    %c0_19 = arith.constant 0 : index
    %21 = vector.load %arg1[%c0_17, %c2, %c0_18, %c0_19] : memref<1x3x16x40xf32, #tpu.memory_space<vmem>>, vector<1x1x8x40xf32>
    %22 = vector.shape_cast %21 : vector<1x1x8x40xf32> to vector<1x8x40xf32>
    %c0_20 = arith.constant 0 : index
    %c2_21 = arith.constant 2 : index
    %c8_22 = arith.constant 8 : index
    %c0_23 = arith.constant 0 : index
    %23 = vector.load %arg1[%c0_20, %c2_21, %c8_22, %c0_23] : memref<1x3x16x40xf32, #tpu.memory_space<vmem>>, vector<1x1x8x40xf32>
    %24 = vector.shape_cast %23 : vector<1x1x8x40xf32> to vector<1x8x40xf32>
    %25 = arith.maximumf %22, %24 : vector<1x8x40xf32>
    %cst_24 = arith.constant dense<0xFF800000> : vector<1x40xf32>
    %26 = vector.multi_reduction <maximumf>, %25, %cst_24 [1] : vector<1x8x40xf32> to vector<1x40xf32>
    %27 = vector.extract_strided_slice %26 {offsets = [0, 1], sizes = [1, 39], strides = [1, 1]} : vector<1x40xf32> to vector<1x39xf32>
    %cst_25 = arith.constant 0.000000e+00 : f32
    %28 = vector.broadcast %cst_25 : f32 to vector<1x1xf32>
    %29 = tpu.concatenate %27, %28 in 1 : vector<1x39xf32>, vector<1x1xf32> -> vector<1x40xf32>
    %30 = arith.maximumf %26, %29 : vector<1x40xf32>
    %31 = vector.extract_strided_slice %10 {offsets = [0, 0], sizes = [1, 38], strides = [1, 1]} : vector<1x40xf32> to vector<1x38xf32>
    %32 = tpu.concatenate %0, %31 in 1 : vector<1x2xf32>, vector<1x38xf32> -> vector<1x40xf32>
    %33 = vector.extract_strided_slice %10 {offsets = [0, 2], sizes = [1, 38], strides = [1, 1]} : vector<1x40xf32> to vector<1x38xf32>
    %34 = tpu.concatenate %33, %0 in 1 : vector<1x38xf32>, vector<1x2xf32> -> vector<1x40xf32>
    %35 = vector.extract_strided_slice %20 {offsets = [0, 0], sizes = [1, 38], strides = [1, 1]} : vector<1x40xf32> to vector<1x38xf32>
    %36 = tpu.concatenate %0, %35 in 1 : vector<1x2xf32>, vector<1x38xf32> -> vector<1x40xf32>
    %37 = vector.extract_strided_slice %20 {offsets = [0, 2], sizes = [1, 38], strides = [1, 1]} : vector<1x40xf32> to vector<1x38xf32>
    %38 = tpu.concatenate %37, %0 in 1 : vector<1x38xf32>, vector<1x2xf32> -> vector<1x40xf32>
    %39 = vector.extract_strided_slice %30 {offsets = [0, 0], sizes = [1, 38], strides = [1, 1]} : vector<1x40xf32> to vector<1x38xf32>
    %40 = tpu.concatenate %0, %39 in 1 : vector<1x2xf32>, vector<1x38xf32> -> vector<1x40xf32>
    %41 = vector.extract_strided_slice %30 {offsets = [0, 2], sizes = [1, 38], strides = [1, 1]} : vector<1x40xf32> to vector<1x38xf32>
    %42 = tpu.concatenate %41, %0 in 1 : vector<1x38xf32>, vector<1x2xf32> -> vector<1x40xf32>
    %cst_26 = arith.constant 0.000000e+00 : f32
    %43 = vector.broadcast %cst_26 : f32 to vector<1x40xf32>
    %c0_27 = arith.constant 0 : index
    %44 = memref.load %arg3[%c0_27] : memref<3xf32, #tpu.memory_space<smem>>
    %45 = vector.broadcast %44 : f32 to vector<1x40xf32>
    %46 = arith.addf %43, %45 : vector<1x40xf32>
    %c0_28 = arith.constant 0 : index
    %47 = memref.load %arg2[%c0_28] : memref<27xf32, #tpu.memory_space<smem>>
    %48 = vector.broadcast %47 : f32 to vector<1x40xf32>
    %49 = arith.mulf %48, %32 : vector<1x40xf32>
    %50 = arith.addf %46, %49 : vector<1x40xf32>
    %c1_29 = arith.constant 1 : index
    %51 = memref.load %arg2[%c1_29] : memref<27xf32, #tpu.memory_space<smem>>
    %52 = vector.broadcast %51 : f32 to vector<1x40xf32>
    %53 = arith.mulf %52, %10 : vector<1x40xf32>
    %54 = arith.addf %50, %53 : vector<1x40xf32>
    %c2_30 = arith.constant 2 : index
    %55 = memref.load %arg2[%c2_30] : memref<27xf32, #tpu.memory_space<smem>>
    %56 = vector.broadcast %55 : f32 to vector<1x40xf32>
    %57 = arith.mulf %56, %34 : vector<1x40xf32>
    %58 = arith.addf %54, %57 : vector<1x40xf32>
    %c3 = arith.constant 3 : index
    %59 = memref.load %arg2[%c3] : memref<27xf32, #tpu.memory_space<smem>>
    %60 = vector.broadcast %59 : f32 to vector<1x40xf32>
    %61 = arith.mulf %60, %36 : vector<1x40xf32>
    %62 = arith.addf %58, %61 : vector<1x40xf32>
    %c4 = arith.constant 4 : index
    %63 = memref.load %arg2[%c4] : memref<27xf32, #tpu.memory_space<smem>>
    %64 = vector.broadcast %63 : f32 to vector<1x40xf32>
    %65 = arith.mulf %64, %20 : vector<1x40xf32>
    %66 = arith.addf %62, %65 : vector<1x40xf32>
    %c5 = arith.constant 5 : index
    %67 = memref.load %arg2[%c5] : memref<27xf32, #tpu.memory_space<smem>>
    %68 = vector.broadcast %67 : f32 to vector<1x40xf32>
    %69 = arith.mulf %68, %38 : vector<1x40xf32>
    %70 = arith.addf %66, %69 : vector<1x40xf32>
    %c6 = arith.constant 6 : index
    %71 = memref.load %arg2[%c6] : memref<27xf32, #tpu.memory_space<smem>>
    %72 = vector.broadcast %71 : f32 to vector<1x40xf32>
    %73 = arith.mulf %72, %40 : vector<1x40xf32>
    %74 = arith.addf %70, %73 : vector<1x40xf32>
    %c7 = arith.constant 7 : index
    %75 = memref.load %arg2[%c7] : memref<27xf32, #tpu.memory_space<smem>>
    %76 = vector.broadcast %75 : f32 to vector<1x40xf32>
    %77 = arith.mulf %76, %30 : vector<1x40xf32>
    %78 = arith.addf %74, %77 : vector<1x40xf32>
    %c8_31 = arith.constant 8 : index
    %79 = memref.load %arg2[%c8_31] : memref<27xf32, #tpu.memory_space<smem>>
    %80 = vector.broadcast %79 : f32 to vector<1x40xf32>
    %81 = arith.mulf %80, %42 : vector<1x40xf32>
    %82 = arith.addf %78, %81 : vector<1x40xf32>
    %cst_32 = arith.constant 0.000000e+00 : f32
    %83 = vector.broadcast %cst_32 : f32 to vector<1x40xf32>
    %84 = arith.maximumf %82, %83 : vector<1x40xf32>
    %cst_33 = arith.constant 0.000000e+00 : f32
    %85 = vector.broadcast %cst_33 : f32 to vector<1x40xf32>
    %c1_34 = arith.constant 1 : index
    %86 = memref.load %arg3[%c1_34] : memref<3xf32, #tpu.memory_space<smem>>
    %87 = vector.broadcast %86 : f32 to vector<1x40xf32>
    %88 = arith.addf %85, %87 : vector<1x40xf32>
    %c9 = arith.constant 9 : index
    %89 = memref.load %arg2[%c9] : memref<27xf32, #tpu.memory_space<smem>>
    %90 = vector.broadcast %89 : f32 to vector<1x40xf32>
    %91 = arith.mulf %90, %32 : vector<1x40xf32>
    %92 = arith.addf %88, %91 : vector<1x40xf32>
    %c10 = arith.constant 10 : index
    %93 = memref.load %arg2[%c10] : memref<27xf32, #tpu.memory_space<smem>>
    %94 = vector.broadcast %93 : f32 to vector<1x40xf32>
    %95 = arith.mulf %94, %10 : vector<1x40xf32>
    %96 = arith.addf %92, %95 : vector<1x40xf32>
    %c11 = arith.constant 11 : index
    %97 = memref.load %arg2[%c11] : memref<27xf32, #tpu.memory_space<smem>>
    %98 = vector.broadcast %97 : f32 to vector<1x40xf32>
    %99 = arith.mulf %98, %34 : vector<1x40xf32>
    %100 = arith.addf %96, %99 : vector<1x40xf32>
    %c12 = arith.constant 12 : index
    %101 = memref.load %arg2[%c12] : memref<27xf32, #tpu.memory_space<smem>>
    %102 = vector.broadcast %101 : f32 to vector<1x40xf32>
    %103 = arith.mulf %102, %36 : vector<1x40xf32>
    %104 = arith.addf %100, %103 : vector<1x40xf32>
    %c13 = arith.constant 13 : index
    %105 = memref.load %arg2[%c13] : memref<27xf32, #tpu.memory_space<smem>>
    %106 = vector.broadcast %105 : f32 to vector<1x40xf32>
    %107 = arith.mulf %106, %20 : vector<1x40xf32>
    %108 = arith.addf %104, %107 : vector<1x40xf32>
    %c14 = arith.constant 14 : index
    %109 = memref.load %arg2[%c14] : memref<27xf32, #tpu.memory_space<smem>>
    %110 = vector.broadcast %109 : f32 to vector<1x40xf32>
    %111 = arith.mulf %110, %38 : vector<1x40xf32>
    %112 = arith.addf %108, %111 : vector<1x40xf32>
    %c15 = arith.constant 15 : index
    %113 = memref.load %arg2[%c15] : memref<27xf32, #tpu.memory_space<smem>>
    %114 = vector.broadcast %113 : f32 to vector<1x40xf32>
    %115 = arith.mulf %114, %40 : vector<1x40xf32>
    %116 = arith.addf %112, %115 : vector<1x40xf32>
    %c16 = arith.constant 16 : index
    %117 = memref.load %arg2[%c16] : memref<27xf32, #tpu.memory_space<smem>>
    %118 = vector.broadcast %117 : f32 to vector<1x40xf32>
    %119 = arith.mulf %118, %30 : vector<1x40xf32>
    %120 = arith.addf %116, %119 : vector<1x40xf32>
    %c17 = arith.constant 17 : index
    %121 = memref.load %arg2[%c17] : memref<27xf32, #tpu.memory_space<smem>>
    %122 = vector.broadcast %121 : f32 to vector<1x40xf32>
    %123 = arith.mulf %122, %42 : vector<1x40xf32>
    %124 = arith.addf %120, %123 : vector<1x40xf32>
    %cst_35 = arith.constant 0.000000e+00 : f32
    %125 = vector.broadcast %cst_35 : f32 to vector<1x40xf32>
    %126 = arith.maximumf %124, %125 : vector<1x40xf32>
    %cst_36 = arith.constant 0.000000e+00 : f32
    %127 = vector.broadcast %cst_36 : f32 to vector<1x40xf32>
    %c2_37 = arith.constant 2 : index
    %128 = memref.load %arg3[%c2_37] : memref<3xf32, #tpu.memory_space<smem>>
    %129 = vector.broadcast %128 : f32 to vector<1x40xf32>
    %130 = arith.addf %127, %129 : vector<1x40xf32>
    %c18 = arith.constant 18 : index
    %131 = memref.load %arg2[%c18] : memref<27xf32, #tpu.memory_space<smem>>
    %132 = vector.broadcast %131 : f32 to vector<1x40xf32>
    %133 = arith.mulf %132, %32 : vector<1x40xf32>
    %134 = arith.addf %130, %133 : vector<1x40xf32>
    %c19 = arith.constant 19 : index
    %135 = memref.load %arg2[%c19] : memref<27xf32, #tpu.memory_space<smem>>
    %136 = vector.broadcast %135 : f32 to vector<1x40xf32>
    %137 = arith.mulf %136, %10 : vector<1x40xf32>
    %138 = arith.addf %134, %137 : vector<1x40xf32>
    %c20 = arith.constant 20 : index
    %139 = memref.load %arg2[%c20] : memref<27xf32, #tpu.memory_space<smem>>
    %140 = vector.broadcast %139 : f32 to vector<1x40xf32>
    %141 = arith.mulf %140, %34 : vector<1x40xf32>
    %142 = arith.addf %138, %141 : vector<1x40xf32>
    %c21 = arith.constant 21 : index
    %143 = memref.load %arg2[%c21] : memref<27xf32, #tpu.memory_space<smem>>
    %144 = vector.broadcast %143 : f32 to vector<1x40xf32>
    %145 = arith.mulf %144, %36 : vector<1x40xf32>
    %146 = arith.addf %142, %145 : vector<1x40xf32>
    %c22 = arith.constant 22 : index
    %147 = memref.load %arg2[%c22] : memref<27xf32, #tpu.memory_space<smem>>
    %148 = vector.broadcast %147 : f32 to vector<1x40xf32>
    %149 = arith.mulf %148, %20 : vector<1x40xf32>
    %150 = arith.addf %146, %149 : vector<1x40xf32>
    %c23 = arith.constant 23 : index
    %151 = memref.load %arg2[%c23] : memref<27xf32, #tpu.memory_space<smem>>
    %152 = vector.broadcast %151 : f32 to vector<1x40xf32>
    %153 = arith.mulf %152, %38 : vector<1x40xf32>
    %154 = arith.addf %150, %153 : vector<1x40xf32>
    %c24 = arith.constant 24 : index
    %155 = memref.load %arg2[%c24] : memref<27xf32, #tpu.memory_space<smem>>
    %156 = vector.broadcast %155 : f32 to vector<1x40xf32>
    %157 = arith.mulf %156, %40 : vector<1x40xf32>
    %158 = arith.addf %154, %157 : vector<1x40xf32>
    %c25 = arith.constant 25 : index
    %159 = memref.load %arg2[%c25] : memref<27xf32, #tpu.memory_space<smem>>
    %160 = vector.broadcast %159 : f32 to vector<1x40xf32>
    %161 = arith.mulf %160, %30 : vector<1x40xf32>
    %162 = arith.addf %158, %161 : vector<1x40xf32>
    %c26 = arith.constant 26 : index
    %163 = memref.load %arg2[%c26] : memref<27xf32, #tpu.memory_space<smem>>
    %164 = vector.broadcast %163 : f32 to vector<1x40xf32>
    %165 = arith.mulf %164, %42 : vector<1x40xf32>
    %166 = arith.addf %162, %165 : vector<1x40xf32>
    %cst_38 = arith.constant 0.000000e+00 : f32
    %167 = vector.broadcast %cst_38 : f32 to vector<1x40xf32>
    %168 = arith.maximumf %166, %167 : vector<1x40xf32>
    %cst_39 = arith.constant 0.000000e+00 : f32
    %169 = vector.broadcast %cst_39 : f32 to vector<1x40xf32>
    %c0_40 = arith.constant 0 : index
    %170 = memref.load %arg5[%c0_40] : memref<3xf32, #tpu.memory_space<smem>>
    %171 = vector.broadcast %170 : f32 to vector<1x40xf32>
    %172 = arith.addf %169, %171 : vector<1x40xf32>
    %c0_41 = arith.constant 0 : index
    %173 = memref.load %arg4[%c0_41] : memref<9xf32, #tpu.memory_space<smem>>
    %174 = vector.broadcast %173 : f32 to vector<1x40xf32>
    %175 = arith.mulf %174, %84 : vector<1x40xf32>
    %176 = arith.addf %172, %175 : vector<1x40xf32>
    %c1_42 = arith.constant 1 : index
    %177 = memref.load %arg4[%c1_42] : memref<9xf32, #tpu.memory_space<smem>>
    %178 = vector.broadcast %177 : f32 to vector<1x40xf32>
    %179 = arith.mulf %178, %126 : vector<1x40xf32>
    %180 = arith.addf %176, %179 : vector<1x40xf32>
    %c2_43 = arith.constant 2 : index
    %181 = memref.load %arg4[%c2_43] : memref<9xf32, #tpu.memory_space<smem>>
    %182 = vector.broadcast %181 : f32 to vector<1x40xf32>
    %183 = arith.mulf %182, %168 : vector<1x40xf32>
    %184 = arith.addf %180, %183 : vector<1x40xf32>
    %cst_44 = arith.constant 0.000000e+00 : f32
    %185 = vector.broadcast %cst_44 : f32 to vector<1x40xf32>
    %186 = arith.maximumf %184, %185 : vector<1x40xf32>
    %cst_45 = arith.constant 0.000000e+00 : f32
    %187 = vector.broadcast %cst_45 : f32 to vector<1x40xf32>
    %c1_46 = arith.constant 1 : index
    %188 = memref.load %arg5[%c1_46] : memref<3xf32, #tpu.memory_space<smem>>
    %189 = vector.broadcast %188 : f32 to vector<1x40xf32>
    %190 = arith.addf %187, %189 : vector<1x40xf32>
    %c3_47 = arith.constant 3 : index
    %191 = memref.load %arg4[%c3_47] : memref<9xf32, #tpu.memory_space<smem>>
    %192 = vector.broadcast %191 : f32 to vector<1x40xf32>
    %193 = arith.mulf %192, %84 : vector<1x40xf32>
    %194 = arith.addf %190, %193 : vector<1x40xf32>
    %c4_48 = arith.constant 4 : index
    %195 = memref.load %arg4[%c4_48] : memref<9xf32, #tpu.memory_space<smem>>
    %196 = vector.broadcast %195 : f32 to vector<1x40xf32>
    %197 = arith.mulf %196, %126 : vector<1x40xf32>
    %198 = arith.addf %194, %197 : vector<1x40xf32>
    %c5_49 = arith.constant 5 : index
    %199 = memref.load %arg4[%c5_49] : memref<9xf32, #tpu.memory_space<smem>>
    %200 = vector.broadcast %199 : f32 to vector<1x40xf32>
    %201 = arith.mulf %200, %168 : vector<1x40xf32>
    %202 = arith.addf %198, %201 : vector<1x40xf32>
    %cst_50 = arith.constant 0.000000e+00 : f32
    %203 = vector.broadcast %cst_50 : f32 to vector<1x40xf32>
    %204 = arith.maximumf %202, %203 : vector<1x40xf32>
    %cst_51 = arith.constant 0.000000e+00 : f32
    %205 = vector.broadcast %cst_51 : f32 to vector<1x40xf32>
    %c2_52 = arith.constant 2 : index
    %206 = memref.load %arg5[%c2_52] : memref<3xf32, #tpu.memory_space<smem>>
    %207 = vector.broadcast %206 : f32 to vector<1x40xf32>
    %208 = arith.addf %205, %207 : vector<1x40xf32>
    %c6_53 = arith.constant 6 : index
    %209 = memref.load %arg4[%c6_53] : memref<9xf32, #tpu.memory_space<smem>>
    %210 = vector.broadcast %209 : f32 to vector<1x40xf32>
    %211 = arith.mulf %210, %84 : vector<1x40xf32>
    %212 = arith.addf %208, %211 : vector<1x40xf32>
    %c7_54 = arith.constant 7 : index
    %213 = memref.load %arg4[%c7_54] : memref<9xf32, #tpu.memory_space<smem>>
    %214 = vector.broadcast %213 : f32 to vector<1x40xf32>
    %215 = arith.mulf %214, %126 : vector<1x40xf32>
    %216 = arith.addf %212, %215 : vector<1x40xf32>
    %c8_55 = arith.constant 8 : index
    %217 = memref.load %arg4[%c8_55] : memref<9xf32, #tpu.memory_space<smem>>
    %218 = vector.broadcast %217 : f32 to vector<1x40xf32>
    %219 = arith.mulf %218, %168 : vector<1x40xf32>
    %220 = arith.addf %216, %219 : vector<1x40xf32>
    %cst_56 = arith.constant 0.000000e+00 : f32
    %221 = vector.broadcast %cst_56 : f32 to vector<1x40xf32>
    %222 = arith.maximumf %220, %221 : vector<1x40xf32>
    %223 = tpu.concatenate %186, %204, %222 in 1 : vector<1x40xf32>, vector<1x40xf32>, vector<1x40xf32> -> vector<1x120xf32>
    %224 = vector.shape_cast %223 : vector<1x120xf32> to vector<1x1x120xf32>
    %c0_57 = arith.constant 0 : index
    %c0_58 = arith.constant 0 : index
    %c0_59 = arith.constant 0 : index
    %225 = vector.load %arg6[%c0_57, %c0_58, %c0_59] : memref<1x1x120xf32, #tpu.memory_space<vmem>>, vector<1x1x120xf32>
    tpu.vector_store %arg6[%c0_57, %c0_58, %c0_59], %224 {strides = array<i32>} : memref<1x1x120xf32, #tpu.memory_space<vmem>>, vector<1x1x120xf32>,
    return
  }
  func.func @transform_0(%arg0: i32) -> (i32, i32, i32, i32) {
    %c0_i32 = arith.constant 0 : i32
    %c0_i32_0 = arith.constant 0 : i32
    %c0_i32_1 = arith.constant 0 : i32
    %c0_i32_2 = arith.constant 0 : i32
    return %arg0, %c0_i32, %c0_i32_0, %c0_i32_1 : i32, i32, i32, i32
  }
  func.func @transform_1(%arg0: i32) -> i32 {
    %c0_i32 = arith.constant 0 : i32
    %c0_i32_0 = arith.constant 0 : i32
    return %c0_i32 : i32
  }
  func.func @transform_2(%arg0: i32) -> i32 {
    %c0_i32 = arith.constant 0 : i32
    %c0_i32_0 = arith.constant 0 : i32
    return %c0_i32 : i32
  }
  func.func @transform_3(%arg0: i32) -> i32 {
    %c0_i32 = arith.constant 0 : i32
    %c0_i32_0 = arith.constant 0 : i32
    return %c0_i32 : i32
  }
  func.func @transform_4(%arg0: i32) -> i32 {
    %c0_i32 = arith.constant 0 : i32
    %c0_i32_0 = arith.constant 0 : i32
    return %c0_i32 : i32
  }
  func.func @transform_5(%arg0: i32) -> (i32, i32, i32) {
    %c0_i32 = arith.constant 0 : i32
    %c0_i32_0 = arith.constant 0 : i32
    %c0_i32_1 = arith.constant 0 : i32
    return %arg0, %c0_i32, %c0_i32_0 : i32, i32, i32
  }
}

</mosaic_0001>

<bundles_post_ra>
// kernel: tpu_custom_call.1
= control target key start
LH: loop header
LB: loop body
LE: loop exit
PB: predicated region body
PF: predicated region fallthrough
CT: control target
= control target key end

     0   :  { %s1355_s0 = inlined_call_operand.hbm [shape: f32[2,3,16,40], index: 0, kind: input, shape index: {}]   ;;  %s1356_s1 = inlined_call_operand.hbm [shape: f32[27], index: 1, kind: input, shape index: {}]   ;;  %s1357_s2 = inlined_call_operand.vmem [shape: f32[3], index: 2, kind: input, shape index: {}]   ;;  %s1358_s3 = inlined_call_operand.vmem [shape: f32[9], index: 3, kind: input, shape index: {}]   ;;  %s1359_s4 = inlined_call_operand.vmem [shape: f32[3], index: 4, kind: input, shape index: {}]   ;;  %s1360_s5 = inlined_call_operand.hbm [shape: f32[2,1,120], index: 5, kind: output, shape index: {}]  }
   0x1   :  { %1362 = sst [smem:[#allocation20_spill]] %s1355_s0 }
   0x2   :  { %1363 = sst [smem:[#allocation21_spill]] %s1356_s1 }
   0x3   :  { %1364 = sst [smem:[#allocation22_spill]] %s1357_s2 }
   0x4   :  { %1365 = sst [smem:[#allocation23_spill]] %s1358_s3 }
   0x5   :  { %1366 = sst [smem:[#allocation24_spill]] %s1359_s4 }
   0x6   :  { %10 = vsyncpa [#allocation3], 0 }
   0x7   :  { %12 = vsyncpa [#allocation3 + $0x1], 0 }
   0x8   :  { %13 = vsyncpa [#allocation5], 0 }
   0x9   :  { %14 = vsyncpa [#allocation6], 0 }
   0xa   :  { %15 = vsyncpa [#allocation10], 0 }
   0xb   :  { %16 = vsyncpa [#allocation4], 0 }
   0xc   :  { %18 = vsyncpa [#allocation4 + $0x1], 0  ;;  %s1045_s18 = smov 0   ;;  %s1047_s19 = smov 0  }
   0xd   :  { %s1049_s20 = smov 0   ;;  %s1051_s21 = smov 0  }
   0xe LB: > { %1367 = sst [smem:[#allocation18_spill]] %s998_s20  ;;  %s1066_s22 = sadd.s32 4294967295, %s1002_s21   ;;  %s1002_s21 = sphi %s1051_s21, %s1384_s21   ;;  %s998_s20 = sphi %s1049_s20, %s1381_s20   ;;  %s994_s19 = sphi %s1047_s19, %s1383_s19   ;;  %s990_s18 = sphi %s1045_s18, %s1382_s18  }
   0xf   : > { %s680_s23 = sadd.s32 4294967294, %s1002_s21   ;;  %p44_p0 = scmp.ne.s32.totalorder %s994_s19, %s990_s18 }
  0x10   : > { %p45_p1 = scmp.eq.s32.totalorder %s1066_s22, 0  ;;  %p152_p2 = scmp.eq.s32.totalorder %s1066_s22, 1 }
  0x11   : > { %p158_p3 = scmp.eq.s32.totalorder %s680_s23, 1  ;;  %p681_p5 = scmp.ge.s32.totalorder %s1002_s21, 1 }
  0x12   : > { %p1075_p4 = por %p45_p1, %p44_p0  ;;  %p165_p7 = scmp.lt.s32.totalorder %s1002_s21, 3 }
  0x13   : > { %p1080_p6 = por %p158_p3, %p44_p0  ;;  %s1370_s3 = sld [smem:[#allocation23_spill]] }
  0x14   : > { %p1088_p8 = pnand %p681_p5, %p165_p7  ;;  %s1372_s1 = sld [smem:[#allocation21_spill]] }
  0x15   : > { %s1373_s2 = sld [smem:[#allocation22_spill]]  ;;  %s1004_s14 = smov [#allocation9]  }
  0x16   : > { %p760_p10 = pneg %p1088_p8  ;;  %s1374_s4 = sld [smem:[#allocation24_spill]] }
  0x17   : > { %s1005_s15 = smov [#allocation7]   ;;  %s1006_s16 = smov [#allocation8]  }
  0x18   : > { %p761_p11 = pnand %p760_p10, %p45_p1  ;;  %s1007_s17 = smov [#allocation11]  }
  0x19   : > { %s197_s28 = sshll.u32 %s1370_s3, 4  ;;  %s1107_s23 = sadd.s32 1, %s1002_s21   ;;  %s198_s28 = int_to_ptr.vmem [resolvable:$true] %s197_s28 }
  0x1a   : > { %s177_s7 = sshll.u32 %s1372_s1, 4  ;;  %s28_s26 = ssub.s32 %s1002_s21, %s1107_s23  ;;  %s178_s7 = int_to_ptr.hbm [resolvable:$true] %s177_s7 }
  0x1b   : > { %s187_s10 = sshll.u32 %s1373_s2, 4  ;;  %p29_p12 = scmp.eq.s32.totalorder %s28_s26, 0  ;;  %s188_s10 = int_to_ptr.vmem [resolvable:$true] %s187_s10 }
  0x1c   : > { %s207_s13 = sshll.u32 %s1374_s4, 4  ;;  %s31_s27 = sadd.s32 1, %s998_s20  ;;  %s208_s13 = int_to_ptr.vmem [resolvable:$true] %s207_s13 }
  0x1d   : > { %769 = dma.vmem_to_smem (!%p761_p11), %s198_s28, 16, %s1004_s14, [#allocation10]  }
  0x1e   : > { %763 = dma.hbm_to_smem (!%p761_p11), %s178_s7, 16, %s1005_s15, [#allocation5]  }
  0x1f   : > { %766 = dma.vmem_to_smem (!%p761_p11), %s188_s10, 16, %s1006_s16, [#allocation6]  }
  0x20   : > { %772 = dma.vmem_to_smem (!%p761_p11), %s208_s13, 16, %s1007_s17, [#allocation10]  }
  0x21   : > { %p38_p13 = scmp.ne.s32.totalorder %s998_s20, %s994_s19  ;;  %p39_p0 = scmp.eq.s32.totalorder %s1002_s21, 0 }
  0x22   : > { %s1116_s28 = scalar_select %p29_p12, %s998_s20, %s31_s27  }
  0x23   : > { %p40_p3 = por %p39_p0, %p38_p13  ;;  %p1120_p5 = por %p152_p2, %p38_p13 }
  0x24   : > { %1375 = sst [smem:[#allocation19_spill]] %s1116_s28  ;;  %p785_p7 = scmp.lt.s32.totalorder %s1002_s21, 2 }
  0x25   : > { %s218_s6 = sand.u32 1, %s998_s20   ;;  %s738_s8 = smul.u32 48, %s1002_s21 }
  0x26   : > { %s737_s7 = smul.u32 48, %s218_s6  ;;  %p1127_p10 = pnand %p785_p7, %p40_p3 }
  0x27   : > { %s1378_s0 = sld [smem:[#allocation20_spill]]  ;;  %s219_s16 = scalar_lea.sflag [#allocation3], %s218_s6 }
  0x28   : > { %s222_s13 = scalar_lea.vmem [#allocation2], %s737_s7  ;;  %p898_p11 = pneg %p1127_p10 }
  0x29   : > { %s230_s14 = sshll.u32 %s222_s13, 4  ;;  %s231_s14 = int_to_ptr.vmem [resolvable:$true] %s230_s14 }
  0x2d   : > { %s227_s12 = scalar_lea.hbm %s1378_s0, %s738_s8  ;;  %s901_s10 = scalar_lea.hbm %s1378_s0, 96 }
  0x2e   : > { %s228_s15 = sshll.u32 %s227_s12, 4  ;;  %s229_s15 = int_to_ptr.hbm [resolvable:$true] %s228_s15 }
  0x2f   : > { %s894_s17 = sshra.s32 %s229_s15, 4  ;;  %s895_s17 = int_to_ptr.hbm [resolvable:$true] %s894_s17 }
  0x30   : > { %s896_s26 = scalar_lea.hbm %s895_s17, 48  ;;  %p902_p0 = scmp.lt.s32.totalorder %s895_s17, %s1378_s0 }
  0x31   : > { %p897_p2 = scmp.ne.s32.totalorder %s895_s17, %s896_s26  ;;  %p903_p3 = scmp.lt.s32.totalorder %s901_s10, %s896_s26 }
  0x33   : > { %p899_p12 = pnand %p898_p11, %p897_p2  ;;  %p904_p7 = por %p903_p3, %p902_p0 }
  0x35   : > { %p900_p13 = pneg %p899_p12 }
  0x37   : > { %p905_p9 = pnand %p904_p7, %p900_p13 }
  0x39   : > { %908 = shalt.err (!%p905_p9)
}
  0x3a   : > { %s1008_s6 = smov 128   ;;  %s1009_s7 = smov 8  }
  0x3b   : > { %776 = dma.hbm_to_vmem [thread:$0]  (!%p1127_p10), %s229_s15, 768, %s231_s14, %s219_s16, %s1008_s6, %s1008_s6, %s1009_s7  }
  0x3c   : > { %242 = sbr.rel (%p1088_p8) target bundleno = 476 (0x1dc), region = 40  ;;  %s1147_s1 = sand.u32 (!%p1088_p8), 1, %s994_s19  }
  0x3d   : > { %s739_s12 = smul.u32 (!%p1088_p8), 48, %s1147_s1  ;;  %s245_s13 = scalar_lea.sflag (!%p1088_p8), [#allocation3], %s1147_s1 }
  0x3f   : > { %s248_s17 = scalar_lea.vmem (!%p1088_p8), [#allocation2], %s739_s12 }
  0x41   : > { %969 = dma.done.wait (%p1075_p4), %s245_s13, 768  }
  0x42   : > { %971 = vsyncadd (%p1075_p4), %s245_s13, 4294966528 }
  0x43   : > { %973 = dma.done.wait (%p45_p1), [#allocation5], 16  }
  0x44   : > { %975 = vsyncadd (%p45_p1), [#allocation5], 4294967280 }
  0x45   : > { %977 = dma.done.wait (%p45_p1), [#allocation6], 16  }
  0x46   : > { %979 = vsyncadd (%p45_p1), [#allocation6], 4294967280 }
  0x47   : > { %981 = dma.done.wait (%p45_p1), [#allocation10], 32  }
  0x48   : > { %983 = vsyncadd (%p45_p1), [#allocation10], 4294967264 }
  0x49   : > { %274 = sfence }
  0x4a   : > { %v296_v0 = vld [vmem:[%s248_s17] sm:$0xff]  ;;  %v297_v1 = vld [vmem:[%s248_s17 + $0x8] sm:$0xff]  ;;  %vm299_vm0 = vcmask 326656   ;;  %v693_v2 = vld [vmem:[%s248_s17 + $0x10] sm:$0xff]  ;;  %s1010_s24 = smov 127   ;;  %vm311_vm1 = vcmask 318464  }
  0x4b   : > { %v298_v3 = vmax.f32 %v296_v0, %v297_v1  ;;  %v694_v4 = vld [vmem:[%s248_s17 + $0x18] sm:$0xff]  ;;  %v695_v5 = vld [vmem:[%s248_s17 + $0x20] sm:$0xff]  ;;  %v696_v6 = vld [vmem:[%s248_s17 + $0x28] sm:$0xff]  ;;  %s1011_s29 = smov 126   ;;  %s1012_s9 = smov 2   ;;  %vm357_vm2 = vcmask 310272  }
  0x4c   : > { %v317_v7 = vmax.f32 %v693_v2, %v694_v4  ;;  %v334_v8 = vmax.f32 %v695_v5, %v696_v6  ;;  %s1178_s14 = sld [smem:[#allocation7 + $0x1]]  ;;  %vm352_vm3 = vcmask 15360   ;;  %vm554_vm4 = vcmask 654336  }
  0x4d   : > { %v300_v9 = vsel %vm299_vm0, %v298_v3, -inf  ;;  %s1180_s15 = sld [smem:[#allocation7 + $0xa]]  ;;  %vm556_vm5 = vcmask 974848  }
  0x4e   : > { %v301_v10 = vrot.slane %v300_v9, 4  ;;  %v318_v11 = vsel %vm299_vm0, %v317_v7, -inf  ;;  %v335_v12 = vsel %vm299_vm0, %v334_v8, -inf  ;;  %s1182_s16 = sld [smem:[#allocation7 + $0x13]] }
  0x4f   : > { %v319_v13 = vrot.slane %v318_v11, 4  ;;  %v336_v14 = vrot.slane %v335_v12, 4  ;;  %s1184_s26 = sld [smem:[#allocation7 + $0x4]] }
  0x50   : > { %v302_v15 = vmax.f32 %v300_v9, %v301_v10  ;;  %s1186_s27 = sld [smem:[#allocation7 + $0xd]] }
  0x51   : > { %v320_v16 = vmax.f32 %v318_v11, %v319_v13  ;;  %v337_v17 = vmax.f32 %v335_v12, %v336_v14  ;;  %s1188_s10 = sld [smem:[#allocation7 + $0x16]] }
  0x52   : > { %v303_v18 = vrot.slane %v302_v15, 2  ;;  %s1190_s11 = sld [smem:[#allocation7 + $0x7]]  ;;  %v385_v40 = vstv %s1178_s14 }
  0x53   : > { %v321_v19 = vrot.slane %v320_v16, 2  ;;  %v338_v20 = vrot.slane %v337_v17, 2  ;;  %s1192_s8 = sld [smem:[#allocation7 + $0x2]]  ;;  %v425_v41 = vstv %s1180_s15 }
  0x54   : > { %v304_v21 = vmax.f32 %v302_v15, %v303_v18  ;;  %s1194_s6 = sld [smem:[#allocation7 + $0xb]]  ;;  %v465_v42 = vstv %s1182_s16 }
  0x55   : > { %v339_v22 = vmax.f32 %v337_v17, %v338_v20  ;;  %v322_v24 = vmax.f32 %v320_v16, %v321_v19  ;;  %s1196_s7 = sld [smem:[#allocation7 + $0x14]]  ;;  %v397_v43 = vstv %s1184_s26 }
  0x56   : > { %v305_v23 = vrot.slane %v304_v21, 1  ;;  %s1198_s12 = sld [smem:[#allocation7 + $0x3]]  ;;  %v437_v44 = vstv %s1186_s27 }
  0x57   : > { %v340_v25 = vrot.slane %v339_v22, 1  ;;  %v323_v28 = vrot.slane %v322_v24, 1  ;;  %s1200_s13 = sld [smem:[#allocation8]]  ;;  %v477_v45 = vstv %s1188_s10 }
  0x58   : > { %v306_v26 = vmax.f32 %v304_v21, %v305_v23  ;;  %s1202_s17 = sld [smem:[#allocation7]]  ;;  %v409_v48 = vstv %s1190_s11 }
  0x59   : > { %v341_v27 = vmax.f32 %v339_v22, %v340_v25  ;;  %v324_v29 = vmax.f32 %v322_v24, %v323_v28  ;;  %s1210_s0 = sld [smem:[#allocation8 + $0x2]]  ;;  %v389_v46 = vstv %s1192_s8 }
  0x5a   : > { %308 = vrot.lane.b32.xlu0 %v306_v26, %s1010_s24  ;;  %s1212_s2 = sld [smem:[#allocation7 + $0xc]]  ;;  %v429_v47 = vstv %s1194_s6 }
  0x5b   : > { %343 = vrot.lane.b32.xlu1 %v341_v27, %s1010_s24  ;;  %s1214_s3 = sld [smem:[#allocation7 + $0x15]]  ;;  %v469_v49 = vstv %s1196_s7 }
  0x5c   : > { %s1218_s4 = sld [smem:[#allocation7 + $0x5]]  ;;  %v393_v2 = vstv %s1198_s12 }
  0x5d   : > { %s1223_s28 = sld [smem:[#allocation7 + $0xe]]  ;;  %v378_v57 = vstv %s1200_s13 }
  0x5e   : > { %s1228_s20 = sld [smem:[#allocation7 + $0x17]]  ;;  %v381_v50 = vstv %s1202_s17 }
  0x5f   : > { %s1235_s14 = sld [smem:[#allocation7 + $0x6]]  ;;  %v458_v59 = vstv %s1210_s0 }
  0x60   : > { %s1237_s15 = sld [smem:[#allocation7 + $0xf]]  ;;  %v433_v3 = vstv %s1212_s2 }
  0x61   : > { %s1243_s16 = sld [smem:[#allocation7 + $0x18]]  ;;  %v473_v12 = vstv %s1214_s3 }
  0x62   : > { %326 = vrot.lane.b32.xlu0 %v324_v29, %s1010_s24  ;;  %s1204_s24 = sld [smem:[#allocation7 + $0x9]]  ;;  %v401_v13 = vstv %s1218_s4 }
  0x63   : > { %s1246_s26 = sld [smem:[#allocation7 + $0x10]]  ;;  %v441_v19 = vstv %s1223_s28 }
  0x64   : > { %s1252_s0 = sld [smem:[#allocation7 + $0x19]]  ;;  %v481_v20 = vstv %s1228_s20 }
  0x65   : > { %s1255_s27 = sld [smem:[#allocation7 + $0x8]]  ;;  %v405_v21 = vstv %s1235_s14 }
  0x66   : > { %s1258_s2 = sld [smem:[#allocation7 + $0x11]] }
  0x67   : > { %s1261_s8 = sld [smem:[#allocation7 + $0x1a]] }
  0x68   : > { %v421_v51 = vstv %s1204_s24  ;;  %s1266_s6 = sld [smem:[#allocation9 + $0x6]] }
  0x69   : > { %s1268_s3 = sld [smem:[#allocation9 + $0x7]] }
  0x6a   : > { %s1273_s4 = sld [smem:[#allocation11 + $0x2]] }
  0x6b   : > { %s1275_s20 = sld [smem:[#allocation9 + $0x8]] }
  0x6c   : > { %s1281_s28 = sld [smem:[#allocation11 + $0x1]] }
  0x6d   : > { %s1283_s7 = sld [smem:[#allocation9 + $0x3]] }
  0x6e   : > { %s1286_s10 = sld [smem:[#allocation9 + $0x4]] }
  0x6f   : > { %s1292_s12 = sld [smem:[#allocation9 + $0x5]] }
  0x70   : > { %s1297_s13 = sld [smem:[#allocation9]] }
  0x71   : > { %s1301_s17 = sld [smem:[#allocation11]] }
  0x72   : > { %s1304_s11 = sld [smem:[#allocation9 + $0x1]] }
  0x73   : > { %s1306_s24 = sld [smem:[#allocation9 + $0x2]] }
  0xcc   : > { %v309_v30 = vpop.permute.xlu0 %308 }
  0xcd   : > { %v312_v31 = vsel %vm311_vm1, %v309_v30, 0.0  ;;  %v344_v33 = vpop.permute.xlu1 %343  ;;  %v485_v30 = vstv %s1243_s16  ;;  %s567_s16 = scalar_lea.hbm %s1360_s5, %s1066_s22 }
  0xce   : > { %v313_v32 = vmax.f32 %v306_v26, %v312_v31  ;;  %v346_v34 = vsel %vm311_vm1, %v344_v33, 0.0 }
  0xcf   : > { %v1170_v37 = vmax.f32 %v341_v27, %v346_v34 }
  0xd0   : > { %354 = vrot.lane.b32.xlu2 %v313_v32, %s1011_s29  ;;  %349 = vrot.lane.b32.xlu1 %v313_v32, %s1012_s9  ;;  %v386_v54 = vmul.f32 %v385_v40, %v313_v32  ;;  %v426_v55 = vmul.f32 %v425_v41, %v313_v32  ;;  %v466_v56 = vmul.f32 %v465_v42, %v313_v32 }
  0xd4   : > { %v327_v35 = vpop.permute.xlu0 %326 }
  0xd5   : > { %v329_v36 = vsel %vm311_vm1, %v327_v35, 0.0 }
  0xd6   : > { %v1172_v38 = vmax.f32 %v324_v29, %v329_v36  ;;  %v445_v29 = vstv %s1237_s15 }
  0xd8   : > { %360 = vrot.lane.b32.xlu2 %v1172_v38, %s1012_s9  ;;  %364 = vrot.lane.b32.xlu0 %v1172_v38, %s1011_s29  ;;  %v398_v4 = vmul.f32 %v397_v43, %v1172_v38  ;;  %v438_v5 = vmul.f32 %v437_v44, %v1172_v38 }
  0xd9   : > { %369 = vrot.lane.b32.xlu1 %v1170_v37, %s1012_s9  ;;  %s1208_s9 = sld [smem:[#allocation8 + $0x1]] }
  0xdf   : > { %v418_v58 = vstv %s1208_s9  ;;  %s1014_s9 = smov 40  }
  0xe0   : > { %373 = vrot.lane.b32.xlu2 %v1170_v37, %s1011_s29  ;;  %s1206_s29 = sld [smem:[#allocation7 + $0x12]] }
  0xe6   : > { %v461_v52 = vstv %s1206_s29  ;;  %s1013_s29 = smov 80  }
 0x12a   : > { %v355_v39 = vpop.permute.xlu2 %354 }
 0x12b   : > { %v358_v61 = vsel %vm357_vm2, %v355_v39, 0.0  ;;  %v478_v39 = vmul.f32 %v477_v45, %v1172_v38 }
 0x12c   : > { %v390_v10 = vmul.f32 %v389_v46, %v358_v61  ;;  %v430_v11 = vmul.f32 %v429_v47, %v358_v61  ;;  %v470_v14 = vmul.f32 %v469_v49, %v358_v61 }
 0x132   : > { %v361_v62 = vpop.permute.xlu2 %360 }
 0x133   : > { %v363_v6 = vsel %vm352_vm3, 0.0, %v361_v62 }
 0x134   : > { %v394_v18 = vmul.f32 %v393_v2, %v363_v6  ;;  %v434_v22 = vmul.f32 %v433_v3, %v363_v6  ;;  %v474_v27 = vmul.f32 %v473_v12, %v363_v6  ;;  %v537_v12 = vstv %s1268_s3 }
 0x13a   : > { %v374_v42 = vpop.permute.xlu2 %373 }
 0x142   : > { %v350_v53 = vpop.permute.xlu1 %349 }
 0x143   : > { %v353_v60 = vsel %vm352_vm3, 0.0, %v350_v53  ;;  %v489_v53 = vstv %s1252_s0 }
 0x144   : > { %v382_v63 = vmul.f32 %v381_v50, %v353_v60  ;;  %v422_v0 = vmul.f32 %v421_v51, %v353_v60  ;;  %v462_v1 = vmul.f32 %v461_v52, %v353_v60  ;;  %v449_v50 = vstv %s1246_s26  ;;  %s295_s26 = scalar_lea.vmem [#allocation12], %s1147_s1 }
 0x145   : > { %v410_v52 = vmul.f32 %v409_v48, %v1170_v37  ;;  %v490_v48 = vmul.f32 %v489_v53, %v1170_v37  ;;  %s569_s0 = sshll.u32 %s295_s26, 4  ;;  %s570_s0 = int_to_ptr.vmem [resolvable:$true] %s569_s0 }
 0x146   : > { %v383_v7 = vadd.f32 %v382_v63, %v378_v57  ;;  %v423_v8 = vadd.f32 %v422_v0, %v418_v58  ;;  %v463_v9 = vadd.f32 %v462_v1, %v458_v59  ;;  %v493_v58 = vstv %s1261_s8 }
 0x147   : > { %v450_v59 = vmul.f32 %v449_v50, %v1170_v37 }
 0x148   : > { %v387_v15 = vadd.f32 %v386_v54, %v383_v7  ;;  %v427_v16 = vadd.f32 %v426_v55, %v423_v8  ;;  %v467_v17 = vadd.f32 %v466_v56, %v463_v9  ;;  %v413_v54 = vstv %s1255_s27  ;;  %s571_s27 = sshll.u32 %s567_s16, 4  ;;  %s572_s27 = int_to_ptr.hbm [resolvable:$true] %s571_s27 }
 0x149   : > { %v453_v55 = vstv %s1258_s2  ;;  %v376_v56 = vsel %vm357_vm2, %v374_v42, 0.0  ;;  %v533_v7 = vstv %s1266_s6  ;;  %v517_v8 = vstv %s1283_s7  ;;  %s559_s2 = scalar_lea.sflag [#allocation4], %s1147_s1  ;;  %s938_s8 = sshra.s32 %s572_s27, 4  ;;  %s939_s8 = int_to_ptr.hbm [resolvable:$true] %s938_s8 }
 0x14a   : > { %v391_v23 = vadd.f32 %v390_v10, %v387_v15  ;;  %v431_v24 = vadd.f32 %v430_v11, %v427_v16  ;;  %v471_v25 = vadd.f32 %v470_v14, %v467_v17  ;;  %v365_v26 = vpop.permute.xlu0 %364  ;;  %v414_v63 = vmul.f32 %v413_v54, %v376_v56  ;;  %s940_s6 = scalar_lea.hbm %s939_s8, 1  ;;  %p945_p9 = scmp.lt.s32.totalorder %s939_s8, %s1360_s5 }
 0x14b   : > { %v367_v28 = vsel %vm357_vm2, %v365_v26, 0.0  ;;  %v370_v31 = vpop.permute.xlu1 %369  ;;  %v454_v0 = vmul.f32 %v453_v55, %v376_v56  ;;  %v494_v3 = vmul.f32 %v493_v58, %v376_v56  ;;  %v530_v11 = vstv %s1273_s4  ;;  %p941_p1 = scmp.ne.s32.totalorder %s939_s8, %s940_s6  ;;  %s944_s4 = scalar_lea.hbm %s1360_s5, 2 }
 0x14c   : > { %v395_v32 = vadd.f32 %v394_v18, %v391_v23  ;;  %v402_v33 = vmul.f32 %v401_v13, %v367_v28  ;;  %v435_v34 = vadd.f32 %v434_v22, %v431_v24  ;;  %v442_v35 = vmul.f32 %v441_v19, %v367_v28  ;;  %p946_p10 = scmp.lt.s32.totalorder %s944_s4, %s940_s6 }
 0x14d   : > { %v475_v36 = vadd.f32 %v474_v27, %v471_v25  ;;  %v482_v40 = vmul.f32 %v481_v20, %v367_v28  ;;  %v372_v41 = vsel %vm352_vm3, 0.0, %v370_v31  ;;  %v514_v14 = vstv %s1281_s28  ;;  %p942_p4 = pnand %p941_p1, %p1120_p5 }
 0x14e   : > { %v399_v43 = vadd.f32 %v398_v4, %v395_v32  ;;  %v439_v44 = vadd.f32 %v438_v5, %v435_v34  ;;  %v406_v46 = vmul.f32 %v405_v21, %v372_v41  ;;  %v446_v47 = vmul.f32 %v445_v29, %v372_v41  ;;  %p947_p2 = por %p946_p10, %p945_p9 }
 0x14f   : > { %v479_v49 = vadd.f32 %v478_v39, %v475_v36  ;;  %v486_v38 = vmul.f32 %v485_v30, %v372_v41  ;;  %v521_v15 = vstv %s1286_s10  ;;  %v501_v16 = vstv %s1297_s13  ;;  %p943_p8 = pneg %p942_p4 }
 0x150   : > { %v403_v45 = vadd.f32 %v402_v33, %v399_v43  ;;  %v443_v51 = vadd.f32 %v442_v35, %v439_v44  ;;  %v541_v18 = vstv %s1275_s20  ;;  %v525_v20 = vstv %s1292_s12 }
 0x151   : > { %v483_v57 = vadd.f32 %v482_v40, %v479_v49  ;;  %v498_v22 = vstv %s1301_s17  ;;  %v505_v23 = vstv %s1304_s11  ;;  %v509_v30 = vstv %s1306_s24  ;;  %p948_p11 = pnand %p947_p2, %p943_p8 }
 0x152   : > { %v407_v60 = vadd.f32 %v406_v46, %v403_v45  ;;  %v447_v61 = vadd.f32 %v446_v47, %v443_v51 }
 0x153   : > { %v487_v62 = vadd.f32 %v486_v38, %v483_v57 }
 0x154   : > { %v411_v1 = vadd.f32 %v410_v52, %v407_v60  ;;  %v451_v2 = vadd.f32 %v450_v59, %v447_v61 }
 0x155   : > { %v491_v4 = vadd.f32 %v490_v48, %v487_v62 }
 0x156   : > { %v415_v5 = vadd.f32 %v414_v63, %v411_v1  ;;  %v455_v37 = vadd.f32 %v454_v0, %v451_v2 }
 0x157   : > { %v495_v6 = vadd.f32 %v494_v3, %v491_v4 }
 0x158   : > { %v416_v9 = vmax.f32 %v415_v5, 0.0  ;;  %v456_v10 = vmax.f32 %v455_v37, 0.0 }
 0x159   : > { %v496_v13 = vmax.f32 %v495_v6, 0.0 }
 0x15a   : > { %v534_v17 = vmul.f32 %v533_v7, %v416_v9  ;;  %v518_v19 = vmul.f32 %v517_v8, %v416_v9  ;;  %v538_v21 = vmul.f32 %v537_v12, %v456_v10  ;;  %v522_v26 = vmul.f32 %v521_v15, %v456_v10 }
 0x15b   : > { %v502_v27 = vmul.f32 %v501_v16, %v416_v9  ;;  %v542_v28 = vmul.f32 %v541_v18, %v496_v13  ;;  %v526_v29 = vmul.f32 %v525_v20, %v496_v13  ;;  %v506_v33 = vmul.f32 %v505_v23, %v456_v10 }
 0x15c   : > { %v535_v24 = vadd.f32 %v534_v17, %v530_v11  ;;  %v519_v25 = vadd.f32 %v518_v19, %v514_v14  ;;  %v510_v39 = vmul.f32 %v509_v30, %v496_v13 }
 0x15d   : > { %v503_v34 = vadd.f32 %v502_v27, %v498_v22 }
 0x15e   : > { %v539_v31 = vadd.f32 %v538_v21, %v535_v24  ;;  %v523_v32 = vadd.f32 %v522_v26, %v519_v25 }
 0x15f   : > { %v507_v40 = vadd.f32 %v506_v33, %v503_v34 }
 0x160   : > { %v543_v35 = vadd.f32 %v542_v28, %v539_v31  ;;  %v527_v36 = vadd.f32 %v526_v29, %v523_v32 }
 0x161   : > { %v511_v43 = vadd.f32 %v510_v39, %v507_v40 }
 0x162   : > { %v544_v41 = vmax.f32 %v543_v35, 0.0  ;;  %v528_v42 = vmax.f32 %v527_v36, 0.0 }
 0x163   : > { %v512_v44 = vmax.f32 %v511_v43, 0.0 }
 0x164   : > { %550 = vrot.lane.b32.xlu1 %v544_v41, %s1013_s29  ;;  %546 = vrot.lane.b32.xlu0 %v528_v42, %s1014_s9 }
 0x1d6   : > { %v551_v46 = vpop.permute.xlu1 %550  ;;  %v547_v47 = vpop.permute.xlu0 %546 }
 0x1d7   : > { %v553_v49 = vsel %vm299_vm0, %v512_v44, %v547_v47 }
 0x1d8   : > { %v555_v50 = vsel %vm554_vm4, %v553_v49, %v551_v46 }
 0x1d9   : > { %557 = vst.msk [vmem:[%s295_s26] sm:$0x1] %vm556_vm5, %v555_v50 }
 0x1da   : > { %951 = shalt.err (!%p948_p11)
}
 0x1db   : > { %758 = dma.vmem_to_hbm [thread:$0]  (%p1120_p5), %s570_s0, 16, %s572_s27, %s559_s2  }
 0x1dc PF: > { %s583_s1 = sand.u32 1, %s990_s18   ;;  %p1379_p12 = scmp.ge.s32.totalorder %s1002_s21, 2 }
 0x1dd   : > { %s584_s7 = scalar_lea.sflag [#allocation4], %s583_s1 }
 0x1de   : > { %p778_p13 = pnand %p1379_p12, %p1080_p6 }
 0x1e0   : > { %p779_p0 = pneg %p778_p13 }
 0x1e2   : > { %985 = dma.done.wait (%p779_p0), %s584_s7, 16  }
 0x1e3   : > { %987 = vsyncadd (%p779_p0), %s584_s7, 4294967280  ;;  %s1380_s10 = sld [smem:[#allocation18_spill]]  ;;  %p21_p3 = scmp.ge.s32.totalorder %s1107_s23, 4  }
 0x1e4   : > { %s1381_s20 = sld [smem:[#allocation19_spill]]  ;;  %s1382_s18 = smov %s994_s19 }
 0x1e5   : > { %s1384_s21 = smov %s1107_s23  ;;  %23 = sbr.rel (!%p21_p3) target bundleno = 14 (0xe), region = 105 }
 0x1e9   : > { %s1383_s19 = smov %s1380_s10 }
 0x1ea   :  { %589 = vsyncpa [#allocation3], 1 }
 0x1eb   :  { %591 = vsyncpa [#allocation3 + $0x1], 1 }
 0x1ec   :  { %592 = vsyncpa [#allocation4], 1 }
 0x1ed   :  { %594 = vsyncpa [#allocation4 + $0x1], 1 }
 0x1ee   :  { %595 = vsyncpa [#allocation5], 1 }
 0x1ef   :  { %597 = vsyncpa [#allocation5 + $0x1], 1 }
 0x1f0   :  { %598 = vsyncpa [#allocation6], 1 }
 0x1f1   :  { %600 = vsyncpa [#allocation6 + $0x1], 1 }
 0x1f2   :  { %601 = vsyncpa [#allocation10], 1 }

</bundles_post_ra>
